<compile_context>
chip_gen: v5e
topology: v5e:2x2
jax: 0.10.0
libtpu: 0.0.40
codegen_flags: <defaults>
</compile_context>

<pallas_src>
import jax
import jax.numpy as jnp
from jax.experimental import pallas as pl
from jax.experimental.pallas import tpu as pltpu


# ---------------------------------------------------------------------------
# Kernel
# ---------------------------------------------------------------------------
def sdn_kernel(x_ref, w1_ref, b1_ref, w2_ref, b2_ref, w3_ref, b3_ref, o_ref):
    # layer 1: cast x f32 -> bf16 in-kernel, MXU matmul with f32 accumulation,
    # bias-add + ReLU in f32 (v5e VPU has no bf16 path). dropout(p=0) is identity.
    x = x_ref[...].astype(w1_ref.dtype)
    h1 = jnp.dot(x, w1_ref[...], preferred_element_type=jnp.float32)
    h1 = jnp.maximum(h1 + b1_ref[...], 0.0)
    # layer 2: cast accumulator to bf16 only right before the next MXU pass
    h2 = jnp.dot(h1.astype(w2_ref.dtype), w2_ref[...],
                 preferred_element_type=jnp.float32)
    h2 = jnp.maximum(h2 + b2_ref[...], 0.0)
    # layer 3: linear, no activation
    out = jnp.dot(h2.astype(w3_ref.dtype), w3_ref[...],
                  preferred_element_type=jnp.float32) + b3_ref[...]
    o_ref[...] = out.astype(o_ref.dtype)


# ---------------------------------------------------------------------------
# Helpers
# ---------------------------------------------------------------------------
def _round_up(n, m):
    return (n + m - 1) // m * m


def _num_tensorcores_per_chip():
    """Best-effort detection of TensorCores per chip (2 on v7x, 1 on v5e/v6e)."""
    try:
        kind = jax.devices()[0].device_kind.lower()
    except Exception:
        return 1
    return 2 if "v7" in kind else 1


def prepare_params(params, *, mm_dtype=jnp.bfloat16, pad_out_lanes=True):
    """One-time conversion of params to kernel layout.

    Weights -> bf16 MXU operands, biases -> f32, and (optionally) w3/b3 lane-padded to a
    multiple of 128 so the output store is lane-dense. Call ONCE and reuse per forward.
    Returns (prepared_param_dict, original_output_dim).
    """
    w1 = params["w1"].astype(mm_dtype)
    w2 = params["w2"].astype(mm_dtype)
    w3 = params["w3"].astype(mm_dtype)
    b1 = params["b1"].astype(jnp.float32)
    b2 = params["b2"].astype(jnp.float32)
    b3 = params["b3"].astype(jnp.float32)

    d_out = w3.shape[1]
    if pad_out_lanes:
        d_out_p = _round_up(d_out, 128)
        if d_out_p != d_out:
            w3 = jnp.pad(w3, ((0, 0), (0, d_out_p - d_out)))
            b3 = jnp.pad(b3, ((0, 0), (0, d_out_p - d_out)))

    prepared = dict(w1=w1, b1=b1, w2=w2, b2=b2, w3=w3, b3=b3)
    return prepared, d_out


# ---------------------------------------------------------------------------
# Forward
# ---------------------------------------------------------------------------
def sdn_forward(x, prepared, *, d_out=None, out_dtype=jnp.float32, max_tile_b=512):
    """x: (B, input_size) f32. prepared: output of prepare_params (weights already bf16,
    w3/b3 possibly lane-padded). d_out: logical output width (padding sliced off)."""
    w1, b1 = prepared["w1"], prepared["b1"]
    w2, b2 = prepared["w2"], prepared["b2"]
    w3, b3 = prepared["w3"], prepared["b3"]

    B, d_in = x.shape
    l1 = w1.shape[1]
    l2 = w2.shape[1]
    d_out_p = w3.shape[1]
    if d_out is None:
        d_out = d_out_p

    # --- generation-aware batch tiling --------------------------------------
    # Single-TC chips (v5e/v6e): collapse the grid to one step (a grid is a serial loop
    # there; fewer steps = less pipeline prologue/epilogue). v7x (2 TCs): keep >= n_tc
    # steps so dimension_semantics=("parallel",) shards tiles across both cores.
    n_tc = _num_tensorcores_per_chip()
    B16 = _round_up(B, 16)                              # 16-row multiple (packed sublanes)
    tile_b = _round_up(pl.cdiv(B16, n_tc), 16)
    tile_b = max(16, min(tile_b, max_tile_b))
    B_p = _round_up(B, tile_b)

    x_in = x.astype(jnp.float32)
    if B_p != B:
        x_in = jnp.pad(x_in, ((0, B_p - B), (0, 0)))    # padded rows sliced off below

    grid = (B_p // tile_b,)

    flops = 2 * B_p * (d_in * l1 + l1 * l2 + l2 * d_out_p)
    bytes_accessed = (
        x_in.size * x_in.dtype.itemsize
        + sum(a.size * a.dtype.itemsize for a in (w1, w2, w3, b1, b2, b3))
        + B_p * d_out_p * jnp.dtype(out_dtype).itemsize
    )

    out = pl.pallas_call(
        sdn_kernel,
        out_shape=jax.ShapeDtypeStruct((B_p, d_out_p), out_dtype),
        grid_spec=pltpu.PrefetchScalarGridSpec(
            num_scalar_prefetch=0,
            grid=grid,
            in_specs=[
                pl.BlockSpec((tile_b, d_in), lambda i: (i, 0)),   # x: tiled over batch
                pl.BlockSpec((d_in, l1), lambda i: (0, 0)),       # w1: full, constant block
                pl.BlockSpec((1, l1), lambda i: (0, 0)),          # b1
                pl.BlockSpec((l1, l2), lambda i: (0, 0)),         # w2
                pl.BlockSpec((1, l2), lambda i: (0, 0)),          # b2
                pl.BlockSpec((l2, d_out_p), lambda i: (0, 0)),    # w3 (maybe lane-padded)
                pl.BlockSpec((1, d_out_p), lambda i: (0, 0)),     # b3 (maybe lane-padded)
            ],
            out_specs=pl.BlockSpec((tile_b, d_out_p), lambda i: (i, 0)),
        ),
        compiler_params=pltpu.CompilerParams(
            dimension_semantics=("parallel",),
            # actual footprint << 2 MiB; 32 MiB leaves headroom even on v7x (64 MiB phys.)
            vmem_limit_bytes=32 * 1024 * 1024,
        ),
        cost_estimate=pl.CostEstimate(
            flops=flops, transcendentals=0, bytes_accessed=bytes_accessed),
    )(x_in, w1, b1, w2, b2, w3, b3)

    return out[:B, :d_out]


# ---------------------------------------------------------------------------
# Init + reference
# ---------------------------------------------------------------------------
def init_params(key, input_size, output_size, l1, l2, dtype=jnp.float32):
    """Deterministic init mimicking nn.Linear (uniform +/- 1/sqrt(fan_in))."""
    ks = jax.random.split(key, 6)

    def lin(kw, kb, fan_in, fan_out):
        bound = 1.0 / jnp.sqrt(fan_in)
        w = jax.random.uniform(kw, (fan_in, fan_out), dtype, -bound, bound)
        b = jax.random.uniform(kb, (1, fan_out), dtype, -bound, bound)
        return w, b

    w1, b1 = lin(ks[0], ks[1], input_size, l1)
    w2, b2 = lin(ks[2], ks[3], l1, l2)
    w3, b3 = lin(ks[4], ks[5], l2, output_size)
    return dict(w1=w1, b1=b1, w2=w2, b2=b2, w3=w3, b3=b3)


def sdn_reference(x, p):
    """Pure-JAX reference with the same bf16-operand / f32-accumulation scheme."""
    bf = jnp.bfloat16
    h = jnp.dot(x.astype(bf), p["w1"].astype(bf), preferred_element_type=jnp.float32)
    h = jnp.maximum(h + p["b1"], 0.0)                  # dropout(p=0) is identity
    h = jnp.dot(h.astype(bf), p["w2"].astype(bf), preferred_element_type=jnp.float32)
    h = jnp.maximum(h + p["b2"], 0.0)
    return jnp.dot(h.astype(bf), p["w3"].astype(bf),
                   preferred_element_type=jnp.float32) + p["b3"]


# ---------------------------------------------------------------------------
# Main
# ---------------------------------------------------------------------------
if __name__ == "__main__":
    # 16 sensors -> l1=128 -> l2=256 -> 64-dim state; batch=256.
    # On v7x this gives two 128-row "parallel" tiles (one per TC); on v5e/v6e the grid
    # collapses to a single 256-row step.
    input_size, output_size, l1, l2 = 16, 64, 128, 256
    batch = 256

    key = jax.random.PRNGKey(0)
    kx, kp = jax.random.split(key)
    x = jax.random.normal(kx, (batch, input_size), dtype=jnp.float32)
    params = init_params(kp, input_size, output_size, l1, l2)

    # One-time weight prep (bf16 cast + output lane pad) — hoisted out of the fwd path.
    prepared, d_out = prepare_params(params)

    out = sdn_forward(x, prepared, d_out=d_out)
    out = jax.block_until_ready(out)

    ref = sdn_reference(x, params)
    assert out.shape == (batch, output_size)
    assert jnp.allclose(out, ref, atol=2e-2, rtol=2e-2), "mismatch vs JAX reference"

    print("KERNEL_OK")
</pallas_src>

<mosaic_0001>
module attributes {stable_mosaic.version = 11 : i64} {
  func.func @sdn_kernel(%arg0: i32, %arg1: memref<256x16xf32, #tpu.memory_space<vmem>>, %arg2: memref<16x128xbf16, #tpu.memory_space<vmem>>, %arg3: memref<1x128xf32, #tpu.memory_space<vmem>>, %arg4: memref<128x256xbf16, #tpu.memory_space<vmem>>, %arg5: memref<1x256xf32, #tpu.memory_space<vmem>>, %arg6: memref<256x128xbf16, #tpu.memory_space<vmem>>, %arg7: memref<1x128xf32, #tpu.memory_space<vmem>>, %arg8: memref<256x128xf32, #tpu.memory_space<vmem>>) attributes {dimension_semantics = [#tpu.dimension_semantics<parallel>], iteration_bounds = array<i64: 1>, scalar_prefetch = 0 : i64, scratch_operands = 0 : i64, tpu.core_type = #tpu.core_type<tc>, window_params = [{transform_indices = @transform_0, window_bounds = array<i64: 256, 16>}, {pipeline_mode = #tpu.pipeline_mode<synchronous>, transform_indices = @transform_1, window_bounds = array<i64: 16, 128>}, {pipeline_mode = #tpu.pipeline_mode<synchronous>, transform_indices = @transform_2, window_bounds = array<i64: 1, 128>}, {pipeline_mode = #tpu.pipeline_mode<synchronous>, transform_indices = @transform_3, window_bounds = array<i64: 128, 256>}, {pipeline_mode = #tpu.pipeline_mode<synchronous>, transform_indices = @transform_4, window_bounds = array<i64: 1, 256>}, {pipeline_mode = #tpu.pipeline_mode<synchronous>, transform_indices = @transform_5, window_bounds = array<i64: 256, 128>}, {pipeline_mode = #tpu.pipeline_mode<synchronous>, transform_indices = @transform_6, window_bounds = array<i64: 1, 128>}, {transform_indices = @transform_7, window_bounds = array<i64: 256, 128>}]} {
    %c0 = arith.constant 0 : index
    %c0_0 = arith.constant 0 : index
    %0 = vector.load %arg1[%c0, %c0_0] : memref<256x16xf32, #tpu.memory_space<vmem>>, vector<256x16xf32>
    %1 = arith.truncf %0 : vector<256x16xf32> to vector<256x16xbf16>
    %c0_1 = arith.constant 0 : index
    %c0_2 = arith.constant 0 : index
    %2 = vector.load %arg2[%c0_1, %c0_2] : memref<16x128xbf16, #tpu.memory_space<vmem>>, vector<16x128xbf16>
    %cst = arith.constant dense<0.000000e+00> : vector<256x128xf32>
    %3 = tpu.matmul %1, %2, %cst {dimension_numbers = #tpu.dot_dimension_numbers<[1], [0], [0], [1], [0, 0, 1, 1], [], []>} : vector<256x16xbf16>, vector<16x128xbf16>, vector<256x128xf32> -> vector<256x128xf32>
    %c0_3 = arith.constant 0 : index
    %c0_4 = arith.constant 0 : index
    %4 = vector.load %arg3[%c0_3, %c0_4] : memref<1x128xf32, #tpu.memory_space<vmem>>, vector<1x128xf32>
    %5 = vector.broadcast %4 : vector<1x128xf32> to vector<256x128xf32>
    %6 = arith.addf %3, %5 : vector<256x128xf32>
    %cst_5 = arith.constant 0.000000e+00 : f32
    %7 = vector.broadcast %cst_5 : f32 to vector<256x128xf32>
    %8 = arith.maximumf %6, %7 : vector<256x128xf32>
    %9 = arith.truncf %8 : vector<256x128xf32> to vector<256x128xbf16>
    %c0_6 = arith.constant 0 : index
    %c0_7 = arith.constant 0 : index
    %10 = vector.load %arg4[%c0_6, %c0_7] : memref<128x256xbf16, #tpu.memory_space<vmem>>, vector<128x256xbf16>
    %cst_8 = arith.constant dense<0.000000e+00> : vector<256x256xf32>
    %11 = tpu.matmul %9, %10, %cst_8 {dimension_numbers = #tpu.dot_dimension_numbers<[1], [0], [0], [1], [0, 0, 1, 1], [], []>} : vector<256x128xbf16>, vector<128x256xbf16>, vector<256x256xf32> -> vector<256x256xf32>
    %c0_9 = arith.constant 0 : index
    %c0_10 = arith.constant 0 : index
    %12 = vector.load %arg5[%c0_9, %c0_10] : memref<1x256xf32, #tpu.memory_space<vmem>>, vector<1x256xf32>
    %13 = vector.broadcast %12 : vector<1x256xf32> to vector<256x256xf32>
    %14 = arith.addf %11, %13 : vector<256x256xf32>
    %cst_11 = arith.constant 0.000000e+00 : f32
    %15 = vector.broadcast %cst_11 : f32 to vector<256x256xf32>
    %16 = arith.maximumf %14, %15 : vector<256x256xf32>
    %17 = arith.truncf %16 : vector<256x256xf32> to vector<256x256xbf16>
    %c0_12 = arith.constant 0 : index
    %c0_13 = arith.constant 0 : index
    %18 = vector.load %arg6[%c0_12, %c0_13] : memref<256x128xbf16, #tpu.memory_space<vmem>>, vector<256x128xbf16>
    %cst_14 = arith.constant dense<0.000000e+00> : vector<256x128xf32>
    %19 = tpu.matmul %17, %18, %cst_14 {dimension_numbers = #tpu.dot_dimension_numbers<[1], [0], [0], [1], [0, 0, 1, 1], [], []>} : vector<256x256xbf16>, vector<256x128xbf16>, vector<256x128xf32> -> vector<256x128xf32>
    %c0_15 = arith.constant 0 : index
    %c0_16 = arith.constant 0 : index
    %20 = vector.load %arg7[%c0_15, %c0_16] : memref<1x128xf32, #tpu.memory_space<vmem>>, vector<1x128xf32>
    %21 = vector.broadcast %20 : vector<1x128xf32> to vector<256x128xf32>
    %22 = arith.addf %19, %21 : vector<256x128xf32>
    %c0_17 = arith.constant 0 : index
    %c0_18 = arith.constant 0 : index
    %23 = vector.load %arg8[%c0_17, %c0_18] : memref<256x128xf32, #tpu.memory_space<vmem>>, vector<256x128xf32>
    tpu.vector_store %arg8[%c0_17, %c0_18], %22 {strides = array<i32>} : memref<256x128xf32, #tpu.memory_space<vmem>>, vector<256x128xf32>,
    return
  }
  func.func @transform_0(%arg0: i32) -> (i32, i32) {
    %c0_i32 = arith.constant 0 : i32
    %c0_i32_0 = arith.constant 0 : i32
    return %arg0, %c0_i32 : i32, i32
  }
  func.func @transform_1(%arg0: i32) -> (i32, i32) {
    %c0_i32 = arith.constant 0 : i32
    %c0_i32_0 = arith.constant 0 : i32
    %c0_i32_1 = arith.constant 0 : i32
    return %c0_i32, %c0_i32_0 : i32, i32
  }
  func.func @transform_2(%arg0: i32) -> (i32, i32) {
    %c0_i32 = arith.constant 0 : i32
    %c0_i32_0 = arith.constant 0 : i32
    %c0_i32_1 = arith.constant 0 : i32
    return %c0_i32, %c0_i32_0 : i32, i32
  }
  func.func @transform_3(%arg0: i32) -> (i32, i32) {
    %c0_i32 = arith.constant 0 : i32
    %c0_i32_0 = arith.constant 0 : i32
    %c0_i32_1 = arith.constant 0 : i32
    return %c0_i32, %c0_i32_0 : i32, i32
  }
  func.func @transform_4(%arg0: i32) -> (i32, i32) {
    %c0_i32 = arith.constant 0 : i32
    %c0_i32_0 = arith.constant 0 : i32
    %c0_i32_1 = arith.constant 0 : i32
    return %c0_i32, %c0_i32_0 : i32, i32
  }
  func.func @transform_5(%arg0: i32) -> (i32, i32) {
    %c0_i32 = arith.constant 0 : i32
    %c0_i32_0 = arith.constant 0 : i32
    %c0_i32_1 = arith.constant 0 : i32
    return %c0_i32, %c0_i32_0 : i32, i32
  }
  func.func @transform_6(%arg0: i32) -> (i32, i32) {
    %c0_i32 = arith.constant 0 : i32
    %c0_i32_0 = arith.constant 0 : i32
    %c0_i32_1 = arith.constant 0 : i32
    return %c0_i32, %c0_i32_0 : i32, i32
  }
  func.func @transform_7(%arg0: i32) -> (i32, i32) {
    %c0_i32 = arith.constant 0 : i32
    %c0_i32_0 = arith.constant 0 : i32
    return %arg0, %c0_i32 : i32, i32
  }
}

</mosaic_0001>

<bundles_post_ra>
// kernel: tpu_custom_call.1
= control target key start
LH: loop header
LB: loop body
LE: loop exit
PB: predicated region body
PF: predicated region fallthrough
CT: control target
= control target key end

     0   :  { %vm88_vm0 = vcmask 130048   ;;  %s1689_s0 = inlined_call_operand.vmem [shape: f32[256,16], index: 0, kind: input, shape index: {}]   ;;  %s1690_s1 = inlined_call_operand.vmem [shape: bf16[16,128], index: 1, kind: input, shape index: {}]   ;;  %s1691_s2 = inlined_call_operand.vmem [shape: f32[1,128], index: 2, kind: input, shape index: {}]   ;;  %s1692_s3 = inlined_call_operand.vmem [shape: bf16[128,256], index: 3, kind: input, shape index: {}]   ;;  %s1693_s4 = inlined_call_operand.vmem [shape: f32[1,256], index: 4, kind: input, shape index: {}]   ;;  %s1694_s5 = inlined_call_operand.vmem [shape: bf16[256,128], index: 5, kind: input, shape index: {}]   ;;  %s1695_s6 = inlined_call_operand.vmem [shape: f32[1,128], index: 6, kind: input, shape index: {}]   ;;  %s1696_s7 = inlined_call_operand.hbm [shape: f32[256,128], index: 7, kind: output, shape index: {}]  }
   0x1   :  { %v1158_v0 = vld [vmem:[%s1690_s1] sm:$0xff]  ;;  %v29_v2 = vld [vmem:[%s1689_s0 + $0x8] sm:$0xff] }
   0x2   :  { %v28_v1 = vld [vmem:[%s1689_s0] sm:$0xff]  ;;  %144 = vmatpush.bf16.msra.mxu0 %v1158_v0  ;;  %1191 = vmatpush.bf16.msra.mxu1 %v1158_v0 }
   0x3   :  { %v60_v3 = vpack.c.bf16 %v29_v2, %v28_v1  ;;  %1192 = vmatpush.bf16.msra.mxu2 %v1158_v0  ;;  %1193 = vmatpush.bf16.msra.mxu3 %v1158_v0 }
   0x4   :  { %12 = vsyncpa [#allocation3], 0  ;;  %v30_v4 = vld [vmem:[%s1689_s0 + $0x10] sm:$0xff]  ;;  %v31_v5 = vld [vmem:[%s1689_s0 + $0x18] sm:$0xff]  ;;  %s998_s19 = sshll.u32 %s1696_s7, 4  ;;  %s1235_s20 = smov 8   ;;  %s999_s19 = int_to_ptr.hbm [resolvable:$true] %s998_s19 }
   0x5   :  { %1014 = vmatmul.msk.bf16.vlgmr.msra.gmra.mxu0 %vm88_vm0, %v60_v3  ;;  %v61_v6 = vpack.c.bf16 %v31_v5, %v30_v4  ;;  %v38_v7 = vld [vmem:[%s1689_s0 + $0x50] sm:$0xff]  ;;  %v39_v8 = vld [vmem:[%s1689_s0 + $0x58] sm:$0xff]  ;;  %v32_v10 = vld [vmem:[%s1689_s0 + $0x20] sm:$0xff] }
   0x6   :  { %v65_v9 = vpack.c.bf16 %v39_v8, %v38_v7  ;;  %v33_v11 = vld [vmem:[%s1689_s0 + $0x28] sm:$0xff]  ;;  %v1088_v13 = vld [vmem:[%s1692_s3 + $0x70] sm:$0xf]  ;;  %v1174_v14 = vld [vmem:[%s1692_s3 + $0x74] sm:$0xf0] }
   0x7   :  { %v62_v12 = vpack.c.bf16 %v33_v11, %v32_v10  ;;  %v40_v15 = vld [vmem:[%s1689_s0 + $0x60] sm:$0xff]  ;;  %v1089_v16 = vor.u32 %v1174_v14, %v1088_v13  ;;  %v41_v17 = vld [vmem:[%s1689_s0 + $0x68] sm:$0xff]  ;;  %v1072_v22 = vld [vmem:[%s1692_s3 + $0x50] sm:$0xf] }
   0x8   :  { %1019 = vmatmul.msk.bf16.vlgmr.msra.gmra.mxu1 %vm88_vm0, %v65_v9  ;;  %v1080_v18 = vld [vmem:[%s1692_s3 + $0x60] sm:$0xf]  ;;  %v1172_v19 = vld [vmem:[%s1692_s3 + $0x64] sm:$0xf0]  ;;  %v66_v20 = vpack.c.bf16 %v41_v17, %v40_v15  ;;  %v1170_v23 = vld [vmem:[%s1692_s3 + $0x54] sm:$0xf0] }
   0x9   :  { %376 = vmatpush.bf16.msrb.mxu1 %v1089_v16  ;;  %v1081_v21 = vor.u32 %v1172_v19, %v1080_v18  ;;  %v48_v24 = vld [vmem:[%s1689_s0 + $0xa0] sm:$0xff]  ;;  %v49_v25 = vld [vmem:[%s1689_s0 + $0xa8] sm:$0xff]  ;;  %v1173_v27 = vld [vmem:[%s1692_s3 + $0x74] sm:$0xf]  ;;  %v1073_v30 = vor.u32 %v1170_v23, %v1072_v22 }
   0xa   :  { %v70_v26 = vpack.c.bf16 %v49_v25, %v48_v24  ;;  %v1090_v28 = vld [vmem:[%s1692_s3 + $0x78] sm:$0xf0]  ;;  %v1171_v29 = vld [vmem:[%s1692_s3 + $0x64] sm:$0xf]  ;;  %v1082_v32 = vld [vmem:[%s1692_s3 + $0x68] sm:$0xf0] }
   0xb   :  { %v1093_v31 = vor.u32 %v1173_v27, %v1090_v28  ;;  %v1064_v33 = vld [vmem:[%s1692_s3 + $0x40] sm:$0xf]  ;;  %v1168_v34 = vld [vmem:[%s1692_s3 + $0x44] sm:$0xf0]  ;;  %v34_v35 = vld [vmem:[%s1689_s0 + $0x30] sm:$0xff]  ;;  %v1085_v37 = vor.u32 %v1171_v29, %v1082_v32 }
   0xc   :  { %1024 = vmatmul.msk.bf16.vlgmr.msra.gmra.mxu2 %vm88_vm0, %v70_v26  ;;  %v35_v36 = vld [vmem:[%s1689_s0 + $0x38] sm:$0xff]  ;;  %v1169_v38 = vld [vmem:[%s1692_s3 + $0x54] sm:$0xf]  ;;  %v1065_v40 = vor.u32 %v1168_v34, %v1064_v33  ;;  %v1056_v42 = vld [vmem:[%s1692_s3 + $0x30] sm:$0xf] }
   0xd   :  { %377 = vmatpush.bf16.msrb.mxu1 %v1081_v21  ;;  %465 = vmatpush.bf16.msrb.mxu2 %v1093_v31  ;;  %v1074_v39 = vld [vmem:[%s1692_s3 + $0x58] sm:$0xf0]  ;;  %v63_v41 = vpack.c.bf16 %v35_v36, %v34_v35  ;;  %v1166_v43 = vld [vmem:[%s1692_s3 + $0x34] sm:$0xf0]  ;;  %v42_v44 = vld [vmem:[%s1689_s0 + $0x70] sm:$0xff] }
   0xe   :  { %v43_v45 = vld [vmem:[%s1689_s0 + $0x78] sm:$0xff]  ;;  %v1077_v46 = vor.u32 %v1169_v38, %v1074_v39  ;;  %v1057_v47 = vor.u32 %v1166_v43, %v1056_v42  ;;  %v1048_v48 = vld [vmem:[%s1692_s3 + $0x20] sm:$0xf]  ;;  %v1164_v50 = vld [vmem:[%s1692_s3 + $0x24] sm:$0xf0] }
   0xf   :  { %v67_v49 = vpack.c.bf16 %v43_v45, %v42_v44  ;;  %v50_v51 = vld [vmem:[%s1689_s0 + $0xb0] sm:$0xff]  ;;  %v51_v52 = vld [vmem:[%s1689_s0 + $0xb8] sm:$0xff]  ;;  %v1049_v53 = vor.u32 %v1164_v50, %v1048_v48  ;;  %v1167_v55 = vld [vmem:[%s1692_s3 + $0x44] sm:$0xf] }
  0x10   :  { %v71_v54 = vpack.c.bf16 %v51_v52, %v50_v51  ;;  %v1066_v56 = vld [vmem:[%s1692_s3 + $0x48] sm:$0xf0]  ;;  %v1040_v57 = vld [vmem:[%s1692_s3 + $0x10] sm:$0xf]  ;;  %v1162_v59 = vld [vmem:[%s1692_s3 + $0x14] sm:$0xf0] }
  0x11   :  { %378 = vmatpush.bf16.msrb.mxu1 %v1073_v30  ;;  %466 = vmatpush.bf16.msrb.mxu2 %v1085_v37  ;;  %v1069_v58 = vor.u32 %v1167_v55, %v1066_v56  ;;  %v1165_v60 = vld [vmem:[%s1692_s3 + $0x34] sm:$0xf]  ;;  %v1058_v61 = vld [vmem:[%s1692_s3 + $0x38] sm:$0xf0]  ;;  %v1041_v62 = vor.u32 %v1162_v59, %v1040_v57  ;;  %v36_v0 = vld [vmem:[%s1689_s0 + $0x40] sm:$0xff] }
  0x12   :  { %v1061_v63 = vor.u32 %v1165_v60, %v1058_v61  ;;  %v37_v1 = vld [vmem:[%s1689_s0 + $0x48] sm:$0xff]  ;;  %v44_v3 = vld [vmem:[%s1689_s0 + $0x80] sm:$0xff]  ;;  %v47_v7 = vld [vmem:[%s1689_s0 + $0x98] sm:$0xff] }
  0x13   :  { %v64_v2 = vpack.c.bf16 %v37_v1, %v36_v0  ;;  %v45_v4 = vld [vmem:[%s1689_s0 + $0x88] sm:$0xff]  ;;  %v1163_v9 = vld [vmem:[%s1692_s3 + $0x24] sm:$0xf]  ;;  %v1042_v13 = vld [vmem:[%s1692_s3 + $0x18] sm:$0xf0] }
  0x14   :  { %v68_v5 = vpack.c.bf16 %v45_v4, %v44_v3  ;;  %v1050_v10 = vld [vmem:[%s1692_s3 + $0x28] sm:$0xf0]  ;;  %v1032_v15 = vld [vmem:[%s1692_s3] sm:$0xf]  ;;  %v1160_v16 = vld [vmem:[%s1692_s3 + $0x4] sm:$0xf0] }
  0x15   :  { %1015 = vmatmul.msk.bf16.gmra.mxu0 %vm88_vm0, %v61_v6  ;;  %379 = vmatpush.bf16.msrb.mxu1 %v1065_v40  ;;  %v46_v6 = vld [vmem:[%s1689_s0 + $0x90] sm:$0xff]  ;;  %v1053_v11 = vor.u32 %v1163_v9, %v1050_v10  ;;  %v1159_v17 = vld [vmem:[%s1692_s3 + $0x4] sm:$0xf]  ;;  %v1033_v18 = vor.u32 %v1160_v16, %v1032_v15  ;;  %v1034_v19 = vld [vmem:[%s1692_s3 + $0x8] sm:$0xf0] }
  0x16   :  { %467 = vmatpush.bf16.msrb.mxu2 %v1077_v46  ;;  %v69_v8 = vpack.c.bf16 %v47_v7, %v46_v6  ;;  %v1462_v22 = vld [vmem:[%s1691_s2] ss:$0 sm:$0xff]  ;;  %v53_v31 = vld [vmem:[%s1689_s0 + $0xc8] sm:$0xff]  ;;  %v54_v40 = vld [vmem:[%s1689_s0 + $0xd0] sm:$0xff] }
  0x17   :  { %v52_v30 = vld [vmem:[%s1689_s0 + $0xc0] sm:$0xff]  ;;  %v57_v51 = vld [vmem:[%s1689_s0 + $0xe8] sm:$0xff]  ;;  %v59_v0 = vld [vmem:[%s1689_s0 + $0xf8] sm:$0xff] }
  0x18   :  { %1020 = vmatmul.msk.bf16.gmra.mxu1 %vm88_vm0, %v66_v20  ;;  %v1037_v20 = vor.u32 %v1159_v17, %v1034_v19  ;;  %v72_v32 = vpack.c.bf16 %v53_v31, %v52_v30  ;;  %v56_v50 = vld [vmem:[%s1689_s0 + $0xe0] sm:$0xff]  ;;  %v1181_v4 = vld [vmem:[%s1694_s5 + $0x30] sm:$0xff]  ;;  %v1188_v15 = vld [vmem:[%s1694_s5 + $0x68] sm:$0xff] }
  0x19   :  { %380 = vmatpush.bf16.msrb.mxu1 %v1057_v47 }
  0x1a   :  { %468 = vmatpush.bf16.msrb.mxu2 %v1069_v58  ;;  %1026 = vmatmul.msk.bf16.vlgmr.msra.gmra.mxu3 %vm88_vm0, %v72_v32 }
  0x1c   :  { %1025 = vmatmul.msk.bf16.gmra.mxu2 %vm88_vm0, %v71_v54 }
  0x1d   :  { %381 = vmatpush.bf16.msrb.mxu1 %v1049_v53  ;;  %v74_v53 = vpack.c.bf16 %v57_v51, %v56_v50 }
  0x1e   :  { %469 = vmatpush.bf16.msrb.mxu2 %v1061_v63  ;;  %v58_v63 = vld [vmem:[%s1689_s0 + $0xf0] sm:$0xff] }
  0x1f   :  { %v75_v3 = vpack.c.bf16 %v59_v0, %v58_v63 }
  0x21   :  { %382 = vmatpush.bf16.msrb.mxu1 %v1041_v62  ;;  %v1182_v62 = vld [vmem:[%s1694_s5 + $0x38] sm:$0xff] }
  0x22   :  { %470 = vmatpush.bf16.msrb.mxu2 %v1053_v11  ;;  %782 = vmatpush.bf16.msrb.mxu3 %v1182_v62 }
  0x25   :  { %1016 = vmatmul.msk.bf16.gmra.mxu0 %vm88_vm0, %v62_v12  ;;  %v1161_v12 = vld [vmem:[%s1692_s3 + $0x14] sm:$0xf]  ;;  %383 = vmatpush.bf16.msrb.mxu1 %v1033_v18  ;;  %s1234_s3 = smov 128  }
  0x26   :  { %v1045_v14 = vor.u32 %v1161_v12, %v1042_v13  ;;  %783 = vmatpush.bf16.msrb.mxu3 %v1181_v4  ;;  %v1180_v12 = vld [vmem:[%s1694_s5 + $0x28] sm:$0xff]  ;;  %v1189_v13 = vld [vmem:[%s1694_s5 + $0x70] sm:$0xff] }
  0x28   :  { %1021 = vmatmul.msk.bf16.gmra.mxu1 %vm88_vm0, %v67_v49  ;;  %471 = vmatpush.bf16.msrb.mxu2 %v1045_v14  ;;  %v1179_v14 = vld [vmem:[%s1694_s5 + $0x20] sm:$0xff] }
  0x2a   :  { %784 = vmatpush.bf16.msrb.mxu3 %v1180_v12 }
  0x2c   :  { %472 = vmatpush.bf16.msrb.mxu2 %v1037_v20 }
  0x2e   :  { %785 = vmatpush.bf16.msrb.mxu3 %v1179_v14 }
  0x35   :  { %1017 = vmatmul.msk.bf16.gmra.mxu0 %vm88_vm0, %v63_v41  ;;  %v55_v41 = vld [vmem:[%s1689_s0 + $0xd8] sm:$0xff] }
  0x36   :  { %v73_v42 = vpack.c.bf16 %v55_v41, %v54_v40  ;;  %v1175_v41 = vld [vmem:[%s1694_s5] sm:$0xff] }
  0x38   :  { %1022 = vmatmul.msk.bf16.gmra.mxu1 %vm88_vm0, %v68_v5  ;;  %1027 = vmatmul.msk.bf16.gmra.mxu3 %vm88_vm0, %v73_v42  ;;  %v1184_v42 = vld [vmem:[%s1694_s5 + $0x48] sm:$0xff] }
  0x45   :  { %1018 = vmatmul.msk.bf16.gmra.mxu0 %vm88_vm0, %v64_v2  ;;  %v1190_v2 = vld [vmem:[%s1694_s5 + $0x78] sm:$0xff] }
  0x46   :  { %871 = vmatpush.bf16.msrb.mxu0 %v1190_v2  ;;  %1194 = vmatpush.bf16.msra.mxu2 %v1190_v2 }
  0x48   :  { %1023 = vmatmul.msk.bf16.gmra.mxu1 %vm88_vm0, %v69_v8  ;;  %1028 = vmatmul.msk.bf16.gmra.mxu3 %vm88_vm0, %v74_v53 }
  0x4a   :  { %872 = vmatpush.bf16.msrb.mxu0 %v1189_v13  ;;  %1195 = vmatpush.bf16.msra.mxu2 %v1189_v13 }
  0x4e   :  { %873 = vmatpush.bf16.msrb.mxu0 %v1188_v15  ;;  %1196 = vmatpush.bf16.msra.mxu2 %v1188_v15 }
  0x58   :  { %1029 = vmatmul.msk.bf16.gmra.mxu3 %vm88_vm0, %v75_v3 }
  0x82   :  { %v146_v21 = vpop.f32.mrf.mxu0 }
  0x83   :  { %v147_v23 = vadd.f32 %v1462_v22, %v146_v21 }
  0x85   :  { %v226_v26 = vmax.f32 %v147_v23, 0.0  ;;  %v171_v46 = vpop.f32.mrf.mxu1 }
  0x86   :  { %v172_v17 = vadd.f32 %v1462_v22, %v171_v46  ;;  %v1183_v46 = vld [vmem:[%s1694_s5 + $0x40] sm:$0xff] }
  0x88   :  { %v236_v19 = vmax.f32 %v172_v17, 0.0 }
  0x8a   :  { %v148_v24 = vpop.f32.mrf.mxu0 }
  0x8b   :  { %v149_v25 = vadd.f32 %v1462_v22, %v148_v24  ;;  %v1178_v24 = vld [vmem:[%s1694_s5 + $0x18] sm:$0xff] }
  0x8c   :  { %786 = vmatpush.bf16.msrb.mxu3 %v1178_v24 }
  0x8d   :  { %v227_v27 = vmax.f32 %v149_v25, 0.0  ;;  %v173_v54 = vpop.f32.mrf.mxu1  ;;  %v1187_v25 = vld [vmem:[%s1694_s5 + $0x60] sm:$0xff] }
  0x8e   :  { %v174_v18 = vadd.f32 %v1462_v22, %v173_v54  ;;  %874 = vmatpush.bf16.msrb.mxu0 %v1187_v25  ;;  %1197 = vmatpush.bf16.msra.mxu2 %v1187_v25 }
  0x8f   :  { %v258_v28 = vpack.c.bf16 %v227_v27, %v226_v26  ;;  %v1177_v26 = vld [vmem:[%s1694_s5 + $0x10] sm:$0xff]  ;;  %v1536_v32 = vpop.f32.mrf.mxu2 }
  0x90   :  { %v237_v20 = vmax.f32 %v174_v18, 0.0  ;;  %787 = vmatpush.bf16.msrb.mxu3 %v1177_v26  ;;  %v197_v18 = vadd.f32 %v1462_v22, %v1536_v32 }
  0x91   :  { %384 = vmatmul.bf16.vlgmr.msrb.gmra.mxu1 %v258_v28  ;;  %473 = vmatmul.bf16.vlgmr.msrb.gmra.mxu2 %v258_v28 }
  0x92   :  { %v151_v29 = vpop.f32.mrf.mxu0  ;;  %v263_v23 = vpack.c.bf16 %v237_v20, %v236_v19  ;;  %v246_v24 = vmax.f32 %v197_v18, 0.0 }
  0x93   :  { %v152_v33 = vadd.f32 %v1462_v22, %v151_v29 }
  0x95   :  { %v228_v36 = vmax.f32 %v152_v33, 0.0  ;;  %v176_v61 = vpop.f32.mrf.mxu1 }
  0x96   :  { %v177_v27 = vadd.f32 %v1462_v22, %v176_v61 }
  0x97   :  { %v198_v40 = vpop.f32.mrf.mxu2 }
  0x98   :  { %v238_v30 = vmax.f32 %v177_v27, 0.0  ;;  %v199_v19 = vadd.f32 %v1462_v22, %v198_v40 }
  0x9a   :  { %v153_v34 = vpop.f32.mrf.mxu0  ;;  %v247_v25 = vmax.f32 %v199_v19, 0.0 }
  0x9b   :  { %v154_v35 = vadd.f32 %v1462_v22, %v153_v34  ;;  %v1176_v34 = vld [vmem:[%s1694_s5 + $0x8] sm:$0xff] }
  0x9c   :  { %788 = vmatpush.bf16.msrb.mxu3 %v1176_v34  ;;  %v268_v32 = vpack.c.bf16 %v247_v25, %v246_v24 }
  0x9d   :  { %v229_v37 = vmax.f32 %v154_v35, 0.0  ;;  %v178_v7 = vpop.f32.mrf.mxu1  ;;  %v1186_v35 = vld [vmem:[%s1694_s5 + $0x58] sm:$0xff] }
  0x9e   :  { %v179_v28 = vadd.f32 %v1462_v22, %v178_v7  ;;  %875 = vmatpush.bf16.msrb.mxu0 %v1186_v35  ;;  %1198 = vmatpush.bf16.msra.mxu2 %v1186_v35 }
  0x9f   :  { %v259_v38 = vpack.c.bf16 %v229_v37, %v228_v36  ;;  %v1185_v37 = vld [vmem:[%s1694_s5 + $0x50] sm:$0xff] }
  0xa0   :  { %v239_v31 = vmax.f32 %v179_v28, 0.0  ;;  %789 = vmatpush.bf16.msrb.mxu3 %v1175_v41 }
  0xa1   :  { %389 = vmatmul.bf16.gmra.mxu1 %v259_v38  ;;  %478 = vmatmul.bf16.gmra.mxu2 %v259_v38 }
  0xa2   :  { %v156_v39 = vpop.f32.mrf.mxu0  ;;  %v264_v33 = vpack.c.bf16 %v239_v31, %v238_v30  ;;  %876 = vmatpush.bf16.msrb.mxu0 %v1185_v37  ;;  %1199 = vmatpush.bf16.msra.mxu2 %v1185_v37  ;;  %v206_v31 = vpop.f32.mrf.mxu3 }
  0xa3   :  { %v157_v43 = vadd.f32 %v1462_v22, %v156_v39 }
  0xa5   :  { %v230_v47 = vmax.f32 %v157_v43, 0.0  ;;  %v181_v16 = vpop.f32.mrf.mxu1 }
  0xa6   :  { %v182_v38 = vadd.f32 %v1462_v22, %v181_v16  ;;  %877 = vmatpush.bf16.msrb.mxu0 %v1184_v42  ;;  %1200 = vmatpush.bf16.msra.mxu2 %v1184_v42 }
  0xa8   :  { %v240_v43 = vmax.f32 %v182_v38, 0.0 }
  0xaa   :  { %v158_v44 = vpop.f32.mrf.mxu0  ;;  %878 = vmatpush.bf16.msrb.mxu0 %v1183_v46  ;;  %1201 = vmatpush.bf16.msra.mxu2 %v1183_v46  ;;  %v208_v42 = vpop.f32.mrf.mxu3 }
  0xab   :  { %v159_v45 = vadd.f32 %v1462_v22, %v158_v44 }
  0xad   :  { %v231_v48 = vmax.f32 %v159_v45, 0.0  ;;  %v183_v21 = vpop.f32.mrf.mxu1 }
  0xae   :  { %v184_v39 = vadd.f32 %v1462_v22, %v183_v21 }
  0xaf   :  { %v260_v49 = vpack.c.bf16 %v231_v48, %v230_v47  ;;  %v1558_v48 = vpop.f32.mrf.mxu2 }
  0xb0   :  { %v241_v44 = vmax.f32 %v184_v39, 0.0  ;;  %v202_v39 = vadd.f32 %v1462_v22, %v1558_v48 }
  0xb1   :  { %394 = vmatmul.bf16.gmra.mxu1 %v260_v49  ;;  %483 = vmatmul.bf16.gmra.mxu2 %v260_v49 }
  0xb2   :  { %v161_v52 = vpop.f32.mrf.mxu0  ;;  %v265_v47 = vpack.c.bf16 %v241_v44, %v240_v43 }
  0xb3   :  { %v162_v55 = vadd.f32 %v1462_v22, %v161_v52 }
  0xb5   :  { %v232_v58 = vmax.f32 %v162_v55, 0.0  ;;  %v186_v29 = vpop.f32.mrf.mxu1  ;;  %v290_v55 = vld [vmem:[%s1693_s4] sm:$0x3] }
  0xb6   :  { %v187_v50 = vadd.f32 %v1462_v22, %v186_v29  ;;  %v1570_v0 = vperm.slane %v290_v55, 1 }
  0xb7   :  { %v203_v54 = vpop.f32.mrf.mxu2 }
  0xb8   :  { %v242_v52 = vmax.f32 %v187_v50, 0.0  ;;  %v204_v40 = vadd.f32 %v1462_v22, %v203_v54 }
  0xba   :  { %v163_v56 = vpop.f32.mrf.mxu0  ;;  %v249_v46 = vmax.f32 %v204_v40, 0.0 }
  0xbb   :  { %v164_v57 = vadd.f32 %v1462_v22, %v163_v56 }
  0xbd   :  { %v233_v59 = vmax.f32 %v164_v57, 0.0  ;;  %v188_v36 = vpop.f32.mrf.mxu1 }
  0xbe   :  { %v189_v51 = vadd.f32 %v1462_v22, %v188_v36 }
  0xbf   :  { %v261_v60 = vpack.c.bf16 %v233_v59, %v232_v58  ;;  %v1565_v58 = vperm.slane %v290_v55, 0 }
  0xc0   :  { %v243_v53 = vmax.f32 %v189_v51, 0.0 }
  0xc1   :  { %399 = vmatmul.bf16.gmra.mxu1 %v261_v60  ;;  %488 = vmatmul.bf16.gmra.mxu2 %v261_v60 }
  0xc2   :  { %v166_v1 = vpop.f32.mrf.mxu0  ;;  %v266_v57 = vpack.c.bf16 %v243_v53, %v242_v52 }
  0xc3   :  { %v167_v5 = vadd.f32 %v1462_v22, %v166_v1 }
  0xc5   :  { %v234_v9 = vmax.f32 %v167_v5, 0.0  ;;  %v191_v45 = vpop.f32.mrf.mxu1 }
  0xc6   :  { %v192_v62 = vadd.f32 %v1462_v22, %v191_v45  ;;  %v248_v45 = vmax.f32 %v202_v39, 0.0 }
  0xc8   :  { %v244_v4 = vmax.f32 %v192_v62, 0.0  ;;  %v269_v48 = vpack.c.bf16 %v249_v46, %v248_v45  ;;  %v209_v62 = vadd.f32 %v1462_v22, %v208_v42 }
  0xca   :  { %v168_v6 = vpop.f32.mrf.mxu0 }
  0xcb   :  { %v169_v8 = vadd.f32 %v1462_v22, %v168_v6 }
  0xcd   :  { %v235_v10 = vmax.f32 %v169_v8, 0.0  ;;  %v193_v49 = vpop.f32.mrf.mxu1 }
  0xce   :  { %v194_v63 = vadd.f32 %v1462_v22, %v193_v49 }
  0xcf   :  { %v262_v11 = vpack.c.bf16 %v235_v10, %v234_v9 }
  0xd0   :  { %v245_v5 = vmax.f32 %v194_v63, 0.0 }
  0xd1   :  { %404 = vmatmul.bf16.gmra.mxu1 %v262_v11  ;;  %493 = vmatmul.bf16.gmra.mxu2 %v262_v11 }
  0xd2   :  { %v267_v13 = vpack.c.bf16 %v245_v5, %v244_v4  ;;  %v251_v4 = vmax.f32 %v209_v62, 0.0 }
  0xe1   :  { %409 = vmatmul.bf16.gmra.mxu1 %v263_v23  ;;  %498 = vmatmul.bf16.gmra.mxu2 %v263_v23 }
  0xf1   :  { %414 = vmatmul.bf16.gmra.mxu1 %v264_v33  ;;  %503 = vmatmul.bf16.gmra.mxu2 %v264_v33 }
 0x101   :  { %419 = vmatmul.bf16.gmra.mxu1 %v265_v47  ;;  %508 = vmatmul.bf16.gmra.mxu2 %v265_v47 }
 0x10e   :  { %v385_v56 = vpop.f32.mrf.mxu1 }
 0x10f   :  { %v386_v60 = vadd.f32 %v385_v56, %v1565_v58  ;;  %v211_v56 = vpop.f32.mrf.mxu3 }
 0x110   :  { %v212_v19 = vadd.f32 %v1462_v22, %v211_v56 }
 0x111   :  { %424 = vmatmul.bf16.gmra.mxu1 %v266_v57  ;;  %513 = vmatmul.bf16.gmra.mxu2 %v266_v57  ;;  %v554_v2 = vmax.f32 %v386_v60, 0.0 }
 0x112   :  { %v252_v25 = vmax.f32 %v212_v19, 0.0 }
 0x114   :  { %v474_v59 = vpop.f32.mrf.mxu2 }
 0x115   :  { %v475_v6 = vadd.f32 %v474_v59, %v1570_v0 }
 0x116   :  { %v387_v61 = vpop.f32.mrf.mxu1 }
 0x117   :  { %v388_v1 = vadd.f32 %v387_v61, %v1565_v58  ;;  %v555_v11 = vmax.f32 %v475_v6, 0.0  ;;  %v207_v61 = vadd.f32 %v1462_v22, %v206_v31 }
 0x119   :  { %v556_v3 = vmax.f32 %v388_v1, 0.0 }
 0x11b   :  { %v618_v7 = vpack.c.bf16 %v556_v3, %v554_v2  ;;  %v250_v3 = vmax.f32 %v207_v61, 0.0 }
 0x11c   :  { %v476_v8 = vpop.f32.mrf.mxu2 }
 0x11d   :  { %v477_v9 = vadd.f32 %v476_v8, %v1570_v0  ;;  %790 = vmatmul.bf16.vlgmr.msrb.gmra.mxu3 %v618_v7  ;;  %v213_v8 = vpop.f32.mrf.mxu3 }
 0x11e   :  { %v390_v10 = vpop.f32.mrf.mxu1 }
 0x11f   :  { %v557_v12 = vmax.f32 %v477_v9, 0.0  ;;  %v391_v16 = vadd.f32 %v390_v10, %v1565_v58 }
 0x121   :  { %429 = vmatmul.bf16.gmra.mxu1 %v267_v13  ;;  %518 = vmatmul.bf16.gmra.mxu2 %v267_v13  ;;  %v619_v14 = vpack.c.bf16 %v557_v12, %v555_v11  ;;  %v558_v21 = vmax.f32 %v391_v16, 0.0  ;;  %v270_v13 = vpack.c.bf16 %v251_v4, %v250_v3 }
 0x123   :  { %879 = vmatmul.bf16.vlgmr.msrb.gmra.mxu0 %v619_v14 }
 0x124   :  { %v479_v15 = vpop.f32.mrf.mxu2 }
 0x125   :  { %v480_v26 = vadd.f32 %v479_v15, %v1570_v0  ;;  %v216_v18 = vpop.f32.mrf.mxu3 }
 0x126   :  { %v392_v17 = vpop.f32.mrf.mxu1  ;;  %v217_v40 = vadd.f32 %v1462_v22, %v216_v18 }
 0x127   :  { %v393_v20 = vadd.f32 %v392_v17, %v1565_v58  ;;  %v559_v33 = vmax.f32 %v480_v26, 0.0 }
 0x128   :  { %v254_v46 = vmax.f32 %v217_v40, 0.0 }
 0x129   :  { %v560_v23 = vmax.f32 %v393_v20, 0.0  ;;  %v214_v20 = vadd.f32 %v1462_v22, %v213_v8 }
 0x12b   :  { %v620_v27 = vpack.c.bf16 %v560_v23, %v558_v21  ;;  %v253_v26 = vmax.f32 %v214_v20, 0.0 }
 0x12c   :  { %v481_v28 = vpop.f32.mrf.mxu2 }
 0x12d   :  { %v482_v29 = vadd.f32 %v481_v28, %v1570_v0  ;;  %795 = vmatmul.bf16.gmra.mxu3 %v620_v27 }
 0x12e   :  { %v395_v30 = vpop.f32.mrf.mxu1 }
 0x12f   :  { %v561_v34 = vmax.f32 %v482_v29, 0.0  ;;  %v396_v37 = vadd.f32 %v395_v30, %v1565_v58 }
 0x131   :  { %434 = vmatmul.bf16.gmra.mxu1 %v268_v32  ;;  %523 = vmatmul.bf16.gmra.mxu2 %v268_v32  ;;  %v621_v35 = vpack.c.bf16 %v561_v34, %v559_v33  ;;  %v562_v43 = vmax.f32 %v396_v37, 0.0  ;;  %v271_v32 = vpack.c.bf16 %v253_v26, %v252_v25 }
 0x133   :  { %884 = vmatmul.bf16.gmra.mxu0 %v621_v35  ;;  %v218_v35 = vpop.f32.mrf.mxu3 }
 0x134   :  { %v484_v36 = vpop.f32.mrf.mxu2 }
 0x135   :  { %v485_v47 = vadd.f32 %v484_v36, %v1570_v0 }
 0x136   :  { %v397_v38 = vpop.f32.mrf.mxu1 }
 0x137   :  { %v398_v41 = vadd.f32 %v397_v38, %v1565_v58  ;;  %v563_v53 = vmax.f32 %v485_v47, 0.0 }
 0x139   :  { %v564_v44 = vmax.f32 %v398_v41, 0.0  ;;  %v219_v41 = vadd.f32 %v1462_v22, %v218_v35 }
 0x13b   :  { %v622_v49 = vpack.c.bf16 %v564_v44, %v562_v43  ;;  %v221_v45 = vpop.f32.mrf.mxu3  ;;  %v255_v47 = vmax.f32 %v219_v41, 0.0 }
 0x13c   :  { %v486_v50 = vpop.f32.mrf.mxu2  ;;  %v222_v62 = vadd.f32 %v1462_v22, %v221_v45 }
 0x13d   :  { %v487_v51 = vadd.f32 %v486_v50, %v1570_v0  ;;  %800 = vmatmul.bf16.gmra.mxu3 %v622_v49 }
 0x13e   :  { %v400_v52 = vpop.f32.mrf.mxu1  ;;  %v256_v4 = vmax.f32 %v222_v62, 0.0 }
 0x13f   :  { %v565_v55 = vmax.f32 %v487_v51, 0.0  ;;  %v401_v59 = vadd.f32 %v400_v52, %v1565_v58 }
 0x141   :  { %439 = vmatmul.bf16.gmra.mxu1 %v269_v48  ;;  %528 = vmatmul.bf16.gmra.mxu2 %v269_v48  ;;  %v623_v54 = vpack.c.bf16 %v565_v55, %v563_v53  ;;  %v566_v1 = vmax.f32 %v401_v59, 0.0 }
 0x143   :  { %889 = vmatmul.bf16.gmra.mxu0 %v623_v54  ;;  %v272_v54 = vpack.c.bf16 %v255_v47, %v254_v46 }
 0x144   :  { %v489_v57 = vpop.f32.mrf.mxu2 }
 0x145   :  { %v490_v5 = vadd.f32 %v489_v57, %v1570_v0  ;;  %v223_v57 = vpop.f32.mrf.mxu3 }
 0x146   :  { %v402_v60 = vpop.f32.mrf.mxu1 }
 0x147   :  { %v403_v63 = vadd.f32 %v402_v60, %v1565_v58  ;;  %v567_v11 = vmax.f32 %v490_v5, 0.0 }
 0x149   :  { %v568_v2 = vmax.f32 %v403_v63, 0.0  ;;  %v224_v63 = vadd.f32 %v1462_v22, %v223_v57 }
 0x14b   :  { %v624_v6 = vpack.c.bf16 %v568_v2, %v566_v1  ;;  %v257_v5 = vmax.f32 %v224_v63, 0.0 }
 0x14c   :  { %v491_v7 = vpop.f32.mrf.mxu2 }
 0x14d   :  { %v492_v9 = vadd.f32 %v491_v7, %v1570_v0  ;;  %805 = vmatmul.bf16.gmra.mxu3 %v624_v6 }
 0x14e   :  { %v405_v10 = vpop.f32.mrf.mxu1 }
 0x14f   :  { %v569_v12 = vmax.f32 %v492_v9, 0.0  ;;  %v406_v16 = vadd.f32 %v405_v10, %v1565_v58 }
 0x151   :  { %444 = vmatmul.bf16.gmra.mxu1 %v270_v13  ;;  %533 = vmatmul.bf16.gmra.mxu2 %v270_v13  ;;  %v625_v14 = vpack.c.bf16 %v569_v12, %v567_v11  ;;  %v570_v23 = vmax.f32 %v406_v16, 0.0  ;;  %v273_v13 = vpack.c.bf16 %v257_v5, %v256_v4 }
 0x153   :  { %894 = vmatmul.bf16.gmra.mxu0 %v625_v14 }
 0x154   :  { %v494_v15 = vpop.f32.mrf.mxu2 }
 0x155   :  { %v495_v27 = vadd.f32 %v494_v15, %v1570_v0 }
 0x156   :  { %v407_v17 = vpop.f32.mrf.mxu1 }
 0x157   :  { %v408_v21 = vadd.f32 %v407_v17, %v1565_v58  ;;  %v571_v33 = vmax.f32 %v495_v27, 0.0 }
 0x159   :  { %v572_v24 = vmax.f32 %v408_v21, 0.0 }
 0x15b   :  { %v626_v28 = vpack.c.bf16 %v572_v24, %v570_v23 }
 0x15c   :  { %v496_v29 = vpop.f32.mrf.mxu2 }
 0x15d   :  { %v497_v30 = vadd.f32 %v496_v29, %v1570_v0  ;;  %810 = vmatmul.bf16.gmra.mxu3 %v626_v28 }
 0x15e   :  { %v410_v31 = vpop.f32.mrf.mxu1 }
 0x15f   :  { %v573_v34 = vmax.f32 %v497_v30, 0.0  ;;  %v411_v38 = vadd.f32 %v410_v31, %v1565_v58 }
 0x161   :  { %449 = vmatmul.bf16.gmra.mxu1 %v271_v32  ;;  %538 = vmatmul.bf16.gmra.mxu2 %v271_v32  ;;  %v627_v36 = vpack.c.bf16 %v573_v34, %v571_v33  ;;  %v574_v43 = vmax.f32 %v411_v38, 0.0 }
 0x163   :  { %899 = vmatmul.bf16.gmra.mxu0 %v627_v36 }
 0x164   :  { %v499_v37 = vpop.f32.mrf.mxu2 }
 0x165   :  { %v500_v49 = vadd.f32 %v499_v37, %v1570_v0 }
 0x166   :  { %v412_v39 = vpop.f32.mrf.mxu1 }
 0x167   :  { %v413_v42 = vadd.f32 %v412_v39, %v1565_v58  ;;  %v575_v55 = vmax.f32 %v500_v49, 0.0  ;;  %v1624_v39 = vld [vmem:[%s1695_s6] ss:$0 sm:$0xff]  ;;  %s1233_s6 = smov [#allocation2]  }
 0x168   :  { %s996_s16 = sshll.u32 %s1233_s6, 4  ;;  %s997_s16 = int_to_ptr.vmem [resolvable:$true] %s996_s16 }
 0x169   :  { %v576_v44 = vmax.f32 %v413_v42, 0.0 }
 0x16b   :  { %v628_v50 = vpack.c.bf16 %v576_v44, %v574_v43 }
 0x16c   :  { %v501_v51 = vpop.f32.mrf.mxu2 }
 0x16d   :  { %v502_v52 = vadd.f32 %v501_v51, %v1570_v0  ;;  %815 = vmatmul.bf16.gmra.mxu3 %v628_v50 }
 0x16e   :  { %v415_v53 = vpop.f32.mrf.mxu1 }
 0x16f   :  { %v577_v48 = vmax.f32 %v502_v52, 0.0  ;;  %v416_v60 = vadd.f32 %v415_v53, %v1565_v58 }
 0x171   :  { %454 = vmatmul.bf16.gmra.mxu1 %v272_v54  ;;  %543 = vmatmul.bf16.gmra.mxu2 %v272_v54  ;;  %v629_v56 = vpack.c.bf16 %v577_v48, %v575_v55  ;;  %v578_v2 = vmax.f32 %v416_v60, 0.0 }
 0x173   :  { %904 = vmatmul.bf16.gmra.mxu0 %v629_v56 }
 0x174   :  { %v504_v59 = vpop.f32.mrf.mxu2 }
 0x175   :  { %v505_v6 = vadd.f32 %v504_v59, %v1570_v0 }
 0x176   :  { %v417_v61 = vpop.f32.mrf.mxu1 }
 0x177   :  { %v418_v1 = vadd.f32 %v417_v61, %v1565_v58  ;;  %v579_v11 = vmax.f32 %v505_v6, 0.0 }
 0x179   :  { %v580_v3 = vmax.f32 %v418_v1, 0.0 }
 0x17b   :  { %v630_v7 = vpack.c.bf16 %v580_v3, %v578_v2 }
 0x17c   :  { %v506_v8 = vpop.f32.mrf.mxu2 }
 0x17d   :  { %v507_v9 = vadd.f32 %v506_v8, %v1570_v0  ;;  %820 = vmatmul.bf16.gmra.mxu3 %v630_v7 }
 0x17e   :  { %v420_v10 = vpop.f32.mrf.mxu1 }
 0x17f   :  { %v581_v12 = vmax.f32 %v507_v9, 0.0  ;;  %v421_v15 = vadd.f32 %v420_v10, %v1565_v58 }
 0x181   :  { %459 = vmatmul.bf16.gmra.mxu1 %v273_v13  ;;  %548 = vmatmul.bf16.gmra.mxu2 %v273_v13  ;;  %v631_v22 = vpack.c.bf16 %v581_v12, %v579_v11  ;;  %v582_v18 = vmax.f32 %v421_v15, 0.0 }
 0x183   :  { %909 = vmatmul.bf16.gmra.mxu0 %v631_v22 }
 0x184   :  { %v509_v14 = vpop.f32.mrf.mxu2 }
 0x185   :  { %v510_v20 = vadd.f32 %v509_v14, %v1570_v0 }
 0x186   :  { %v422_v16 = vpop.f32.mrf.mxu1 }
 0x187   :  { %v423_v17 = vadd.f32 %v422_v16, %v1565_v58  ;;  %v583_v26 = vmax.f32 %v510_v20, 0.0 }
 0x189   :  { %v584_v19 = vmax.f32 %v423_v17, 0.0 }
 0x18b   :  { %v632_v21 = vpack.c.bf16 %v584_v19, %v582_v18 }
 0x18c   :  { %v511_v23 = vpop.f32.mrf.mxu2 }
 0x18d   :  { %v512_v24 = vadd.f32 %v511_v23, %v1570_v0  ;;  %825 = vmatmul.bf16.gmra.mxu3 %v632_v21 }
 0x18e   :  { %v425_v25 = vpop.f32.mrf.mxu1 }
 0x18f   :  { %v585_v27 = vmax.f32 %v512_v24, 0.0  ;;  %v426_v30 = vadd.f32 %v425_v25, %v1565_v58 }
 0x191   :  { %v633_v28 = vpack.c.bf16 %v585_v27, %v583_v26  ;;  %v586_v34 = vmax.f32 %v426_v30, 0.0 }
 0x193   :  { %914 = vmatmul.bf16.gmra.mxu0 %v633_v28 }
 0x194   :  { %v514_v29 = vpop.f32.mrf.mxu2 }
 0x195   :  { %v515_v35 = vadd.f32 %v514_v29, %v1570_v0 }
 0x196   :  { %v427_v31 = vpop.f32.mrf.mxu1 }
 0x197   :  { %v428_v33 = vadd.f32 %v427_v31, %v1565_v58  ;;  %v587_v41 = vmax.f32 %v515_v35, 0.0 }
 0x199   :  { %v588_v32 = vmax.f32 %v428_v33, 0.0 }
 0x19b   :  { %v634_v36 = vpack.c.bf16 %v588_v32, %v586_v34 }
 0x19c   :  { %v516_v37 = vpop.f32.mrf.mxu2 }
 0x19d   :  { %v517_v38 = vadd.f32 %v516_v37, %v1570_v0  ;;  %830 = vmatmul.bf16.gmra.mxu3 %v634_v36 }
 0x19e   :  { %v430_v40 = vpop.f32.mrf.mxu1 }
 0x19f   :  { %v589_v42 = vmax.f32 %v517_v38, 0.0  ;;  %v431_v50 = vadd.f32 %v430_v40, %v1565_v58 }
 0x1a0   :  { %v791_v43 = vpop.f32.mrf.mxu3  ;;  %v880_v44 = vpop.f32.mrf.mxu0 }
 0x1a1   :  { %v635_v45 = vpack.c.bf16 %v589_v42, %v587_v41  ;;  %v792_v46 = vadd.f32 %v1624_v39, %v791_v43  ;;  %v590_v48 = vmax.f32 %v431_v50, 0.0 }
 0x1a3   :  { %v881_v47 = vadd.f32 %v880_v44, %v792_v46  ;;  %919 = vmatmul.bf16.gmra.mxu0 %v635_v45 }
 0x1a4   :  { %v519_v49 = vpop.f32.mrf.mxu2 }
 0x1a5   :  { %960 = vst [vmem:[#allocation2] sm:$0xff] %v881_v47  ;;  %v520_v57 = vadd.f32 %v519_v49, %v1570_v0 }
 0x1a6   :  { %v432_v51 = vpop.f32.mrf.mxu1 }
 0x1a7   :  { %v433_v52 = vadd.f32 %v432_v51, %v1565_v58  ;;  %v591_v1 = vmax.f32 %v520_v57, 0.0 }
 0x1a8   :  { %v793_v53 = vpop.f32.mrf.mxu3  ;;  %v882_v55 = vpop.f32.mrf.mxu0 }
 0x1a9   :  { %v592_v54 = vmax.f32 %v433_v52, 0.0  ;;  %v794_v56 = vadd.f32 %v1624_v39, %v793_v53 }
 0x1ab   :  { %v636_v59 = vpack.c.bf16 %v592_v54, %v590_v48  ;;  %v883_v60 = vadd.f32 %v882_v55, %v794_v56 }
 0x1ac   :  { %v521_v61 = vpop.f32.mrf.mxu2 }
 0x1ad   :  { %961 = vst [vmem:[#allocation2 + $0x8] sm:$0xff] %v883_v60  ;;  %v522_v62 = vadd.f32 %v521_v61, %v1570_v0  ;;  %835 = vmatmul.bf16.gmra.mxu3 %v636_v59 }
 0x1ae   :  { %v435_v63 = vpop.f32.mrf.mxu1 }
 0x1af   :  { %v593_v2 = vmax.f32 %v522_v62, 0.0  ;;  %v436_v9 = vadd.f32 %v435_v63, %v1565_v58 }
 0x1b0   :  { %v796_v3 = vpop.f32.mrf.mxu3  ;;  %v885_v4 = vpop.f32.mrf.mxu0 }
 0x1b1   :  { %v637_v5 = vpack.c.bf16 %v593_v2, %v591_v1  ;;  %v797_v6 = vadd.f32 %v1624_v39, %v796_v3  ;;  %v594_v22 = vmax.f32 %v436_v9, 0.0 }
 0x1b3   :  { %v886_v7 = vadd.f32 %v885_v4, %v797_v6  ;;  %924 = vmatmul.bf16.gmra.mxu0 %v637_v5 }
 0x1b4   :  { %v524_v8 = vpop.f32.mrf.mxu2 }
 0x1b5   :  { %962 = vst [vmem:[#allocation2 + $0x10] sm:$0xff] %v886_v7  ;;  %v525_v16 = vadd.f32 %v524_v8, %v1570_v0 }
 0x1b6   :  { %v437_v10 = vpop.f32.mrf.mxu1 }
 0x1b7   :  { %v438_v11 = vadd.f32 %v437_v10, %v1565_v58  ;;  %v595_v23 = vmax.f32 %v525_v16, 0.0 }
 0x1b8   :  { %v798_v12 = vpop.f32.mrf.mxu3  ;;  %v887_v13 = vpop.f32.mrf.mxu0 }
 0x1b9   :  { %v596_v14 = vmax.f32 %v438_v11, 0.0  ;;  %v799_v15 = vadd.f32 %v1624_v39, %v798_v12 }
 0x1bb   :  { %v638_v17 = vpack.c.bf16 %v596_v14, %v594_v22  ;;  %v888_v18 = vadd.f32 %v887_v13, %v799_v15 }
 0x1bc   :  { %v526_v19 = vpop.f32.mrf.mxu2 }
 0x1bd   :  { %963 = vst [vmem:[#allocation2 + $0x18] sm:$0xff] %v888_v18  ;;  %v527_v20 = vadd.f32 %v526_v19, %v1570_v0  ;;  %840 = vmatmul.bf16.gmra.mxu3 %v638_v17 }
 0x1be   :  { %v440_v21 = vpop.f32.mrf.mxu1 }
 0x1bf   :  { %v597_v24 = vmax.f32 %v527_v20, 0.0  ;;  %v441_v31 = vadd.f32 %v440_v21, %v1565_v58 }
 0x1c0   :  { %v801_v25 = vpop.f32.mrf.mxu3  ;;  %v890_v26 = vpop.f32.mrf.mxu0 }
 0x1c1   :  { %v639_v27 = vpack.c.bf16 %v597_v24, %v595_v23  ;;  %v802_v28 = vadd.f32 %v1624_v39, %v801_v25  ;;  %v598_v36 = vmax.f32 %v441_v31, 0.0 }
 0x1c3   :  { %v891_v29 = vadd.f32 %v890_v26, %v802_v28  ;;  %929 = vmatmul.bf16.gmra.mxu0 %v639_v27 }
 0x1c4   :  { %v529_v30 = vpop.f32.mrf.mxu2 }
 0x1c5   :  { %964 = vst [vmem:[#allocation2 + $0x20] sm:$0xff] %v891_v29  ;;  %v530_v40 = vadd.f32 %v529_v30, %v1570_v0 }
 0x1c6   :  { %v442_v33 = vpop.f32.mrf.mxu1 }
 0x1c7   :  { %v443_v34 = vadd.f32 %v442_v33, %v1565_v58  ;;  %v599_v46 = vmax.f32 %v530_v40, 0.0 }
 0x1c8   :  { %v803_v32 = vpop.f32.mrf.mxu3  ;;  %v892_v35 = vpop.f32.mrf.mxu0 }
 0x1c9   :  { %v600_v37 = vmax.f32 %v443_v34, 0.0  ;;  %v804_v38 = vadd.f32 %v1624_v39, %v803_v32 }
 0x1cb   :  { %v640_v41 = vpack.c.bf16 %v600_v37, %v598_v36  ;;  %v893_v42 = vadd.f32 %v892_v35, %v804_v38 }
 0x1cc   :  { %v531_v43 = vpop.f32.mrf.mxu2 }
 0x1cd   :  { %965 = vst [vmem:[#allocation2 + $0x28] sm:$0xff] %v893_v42  ;;  %v532_v44 = vadd.f32 %v531_v43, %v1570_v0  ;;  %845 = vmatmul.bf16.gmra.mxu3 %v640_v41 }
 0x1ce   :  { %v445_v45 = vpop.f32.mrf.mxu1 }
 0x1cf   :  { %v601_v47 = vmax.f32 %v532_v44, 0.0  ;;  %v446_v48 = vadd.f32 %v445_v45, %v1565_v58 }
 0x1d0   :  { %v806_v49 = vpop.f32.mrf.mxu3  ;;  %v895_v50 = vpop.f32.mrf.mxu0 }
 0x1d1   :  { %v641_v51 = vpack.c.bf16 %v601_v47, %v599_v46  ;;  %v807_v52 = vadd.f32 %v1624_v39, %v806_v49  ;;  %v602_v60 = vmax.f32 %v446_v48, 0.0 }
 0x1d3   :  { %v896_v53 = vadd.f32 %v895_v50, %v807_v52  ;;  %934 = vmatmul.bf16.gmra.mxu0 %v641_v51 }
 0x1d4   :  { %v534_v55 = vpop.f32.mrf.mxu2 }
 0x1d5   :  { %966 = vst [vmem:[#allocation2 + $0x30] sm:$0xff] %v896_v53  ;;  %v535_v63 = vadd.f32 %v534_v55, %v1570_v0 }
 0x1d6   :  { %v447_v54 = vpop.f32.mrf.mxu1 }
 0x1d7   :  { %v448_v56 = vadd.f32 %v447_v54, %v1565_v58  ;;  %v603_v6 = vmax.f32 %v535_v63, 0.0 }
 0x1d8   :  { %v808_v57 = vpop.f32.mrf.mxu3  ;;  %v897_v59 = vpop.f32.mrf.mxu0 }
 0x1d9   :  { %v604_v61 = vmax.f32 %v448_v56, 0.0  ;;  %v809_v62 = vadd.f32 %v1624_v39, %v808_v57 }
 0x1db   :  { %v642_v1 = vpack.c.bf16 %v604_v61, %v602_v60  ;;  %v898_v2 = vadd.f32 %v897_v59, %v809_v62 }
 0x1dc   :  { %v536_v3 = vpop.f32.mrf.mxu2 }
 0x1dd   :  { %967 = vst [vmem:[#allocation2 + $0x38] sm:$0xff] %v898_v2  ;;  %v537_v4 = vadd.f32 %v536_v3, %v1570_v0  ;;  %850 = vmatmul.bf16.gmra.mxu3 %v642_v1 }
 0x1de   :  { %v450_v5 = vpop.f32.mrf.mxu1 }
 0x1df   :  { %v605_v7 = vmax.f32 %v537_v4, 0.0  ;;  %v451_v22 = vadd.f32 %v450_v5, %v1565_v58 }
 0x1e0   :  { %v811_v8 = vpop.f32.mrf.mxu3  ;;  %v900_v9 = vpop.f32.mrf.mxu0 }
 0x1e1   :  { %v643_v10 = vpack.c.bf16 %v605_v7, %v603_v6  ;;  %v812_v11 = vadd.f32 %v1624_v39, %v811_v8  ;;  %v606_v18 = vmax.f32 %v451_v22, 0.0 }
 0x1e3   :  { %v901_v12 = vadd.f32 %v900_v9, %v812_v11  ;;  %939 = vmatmul.bf16.gmra.mxu0 %v643_v10 }
 0x1e4   :  { %v539_v13 = vpop.f32.mrf.mxu2 }
 0x1e5   :  { %968 = vst [vmem:[#allocation2 + $0x40] sm:$0xff] %v901_v12  ;;  %v540_v21 = vadd.f32 %v539_v13, %v1570_v0 }
 0x1e6   :  { %v452_v14 = vpop.f32.mrf.mxu1 }
 0x1e7   :  { %v453_v15 = vadd.f32 %v452_v14, %v1565_v58  ;;  %v607_v28 = vmax.f32 %v540_v21, 0.0 }
 0x1e8   :  { %v813_v16 = vpop.f32.mrf.mxu3  ;;  %v902_v17 = vpop.f32.mrf.mxu0 }
 0x1e9   :  { %v608_v19 = vmax.f32 %v453_v15, 0.0  ;;  %v814_v20 = vadd.f32 %v1624_v39, %v813_v16 }
 0x1eb   :  { %v644_v23 = vpack.c.bf16 %v608_v19, %v606_v18  ;;  %v903_v24 = vadd.f32 %v902_v17, %v814_v20 }
 0x1ec   :  { %v541_v25 = vpop.f32.mrf.mxu2 }
 0x1ed   :  { %969 = vst [vmem:[#allocation2 + $0x48] sm:$0xff] %v903_v24  ;;  %v542_v26 = vadd.f32 %v541_v25, %v1570_v0  ;;  %855 = vmatmul.bf16.gmra.mxu3 %v644_v23 }
 0x1ee   :  { %v455_v27 = vpop.f32.mrf.mxu1 }
 0x1ef   :  { %v609_v29 = vmax.f32 %v542_v26, 0.0  ;;  %v456_v36 = vadd.f32 %v455_v27, %v1565_v58 }
 0x1f0   :  { %v816_v30 = vpop.f32.mrf.mxu3  ;;  %v905_v31 = vpop.f32.mrf.mxu0 }
 0x1f1   :  { %v645_v33 = vpack.c.bf16 %v609_v29, %v607_v28  ;;  %v817_v34 = vadd.f32 %v1624_v39, %v816_v30  ;;  %v610_v42 = vmax.f32 %v456_v36, 0.0 }
 0x1f3   :  { %v906_v32 = vadd.f32 %v905_v31, %v817_v34  ;;  %944 = vmatmul.bf16.gmra.mxu0 %v645_v33 }
 0x1f4   :  { %v544_v35 = vpop.f32.mrf.mxu2 }
 0x1f5   :  { %970 = vst [vmem:[#allocation2 + $0x50] sm:$0xff] %v906_v32  ;;  %v545_v45 = vadd.f32 %v544_v35, %v1570_v0 }
 0x1f6   :  { %v457_v37 = vpop.f32.mrf.mxu1 }
 0x1f7   :  { %v458_v38 = vadd.f32 %v457_v37, %v1565_v58  ;;  %v611_v52 = vmax.f32 %v545_v45, 0.0 }
 0x1f8   :  { %v818_v40 = vpop.f32.mrf.mxu3  ;;  %v907_v41 = vpop.f32.mrf.mxu0 }
 0x1f9   :  { %v612_v43 = vmax.f32 %v458_v38, 0.0  ;;  %v819_v44 = vadd.f32 %v1624_v39, %v818_v40 }
 0x1fb   :  { %v646_v46 = vpack.c.bf16 %v612_v43, %v610_v42  ;;  %v908_v47 = vadd.f32 %v907_v41, %v819_v44 }
 0x1fc   :  { %v546_v49 = vpop.f32.mrf.mxu2 }
 0x1fd   :  { %971 = vst [vmem:[#allocation2 + $0x58] sm:$0xff] %v908_v47  ;;  %v547_v50 = vadd.f32 %v546_v49, %v1570_v0  ;;  %860 = vmatmul.bf16.gmra.mxu3 %v646_v46 }
 0x1fe   :  { %v460_v51 = vpop.f32.mrf.mxu1 }
 0x1ff   :  { %v613_v53 = vmax.f32 %v547_v50, 0.0  ;;  %v461_v60 = vadd.f32 %v460_v51, %v1565_v58 }
 0x200   :  { %v821_v55 = vpop.f32.mrf.mxu3  ;;  %v910_v48 = vpop.f32.mrf.mxu0 }
 0x201   :  { %v647_v54 = vpack.c.bf16 %v613_v53, %v611_v52  ;;  %v822_v56 = vadd.f32 %v1624_v39, %v821_v55  ;;  %v614_v2 = vmax.f32 %v461_v60, 0.0 }
 0x203   :  { %v911_v57 = vadd.f32 %v910_v48, %v822_v56  ;;  %949 = vmatmul.bf16.gmra.mxu0 %v647_v54 }
 0x204   :  { %v549_v59 = vpop.f32.mrf.mxu2 }
 0x205   :  { %972 = vst [vmem:[#allocation2 + $0x60] sm:$0xff] %v911_v57  ;;  %v550_v5 = vadd.f32 %v549_v59, %v1570_v0 }
 0x206   :  { %v462_v61 = vpop.f32.mrf.mxu1 }
 0x207   :  { %v463_v62 = vadd.f32 %v462_v61, %v1565_v58  ;;  %v615_v10 = vmax.f32 %v550_v5, 0.0 }
 0x208   :  { %v823_v63 = vpop.f32.mrf.mxu3  ;;  %v912_v1 = vpop.f32.mrf.mxu0 }
 0x209   :  { %v616_v3 = vmax.f32 %v463_v62, 0.0  ;;  %v824_v4 = vadd.f32 %v1624_v39, %v823_v63 }
 0x20b   :  { %v648_v6 = vpack.c.bf16 %v616_v3, %v614_v2  ;;  %v913_v7 = vadd.f32 %v912_v1, %v824_v4 }
 0x20c   :  { %v551_v8 = vpop.f32.mrf.mxu2 }
 0x20d   :  { %973 = vst [vmem:[#allocation2 + $0x68] sm:$0xff] %v913_v7  ;;  %v552_v9 = vadd.f32 %v551_v8, %v1570_v0  ;;  %865 = vmatmul.bf16.gmra.mxu3 %v648_v6 }
 0x20f   :  { %v617_v11 = vmax.f32 %v552_v9, 0.0 }
 0x210   :  { %v826_v12 = vpop.f32.mrf.mxu3  ;;  %v915_v13 = vpop.f32.mrf.mxu0 }
 0x211   :  { %v649_v58 = vpack.c.bf16 %v617_v11, %v615_v10  ;;  %v827_v22 = vadd.f32 %v1624_v39, %v826_v12 }
 0x213   :  { %v916_v14 = vadd.f32 %v915_v13, %v827_v22  ;;  %954 = vmatmul.bf16.vlgmr.msra.gmra.mxu2 %v649_v58 }
 0x215   :  { %974 = vst [vmem:[#allocation2 + $0x70] sm:$0xff] %v916_v14 }
 0x218   :  { %v828_v15 = vpop.f32.mrf.mxu3  ;;  %v917_v16 = vpop.f32.mrf.mxu0 }
 0x219   :  { %v829_v17 = vadd.f32 %v1624_v39, %v828_v15 }
 0x21b   :  { %v918_v18 = vadd.f32 %v917_v16, %v829_v17 }
 0x21d   :  { %975 = vst [vmem:[#allocation2 + $0x78] sm:$0xff] %v918_v18 }
 0x220   :  { %v831_v19 = vpop.f32.mrf.mxu3  ;;  %v920_v20 = vpop.f32.mrf.mxu0 }
 0x221   :  { %v832_v0 = vadd.f32 %v1624_v39, %v831_v19 }
 0x223   :  { %v921_v21 = vadd.f32 %v920_v20, %v832_v0 }
 0x225   :  { %976 = vst [vmem:[#allocation2 + $0x80] sm:$0xff] %v921_v21 }
 0x228   :  { %v833_v23 = vpop.f32.mrf.mxu3  ;;  %v922_v24 = vpop.f32.mrf.mxu0 }
 0x229   :  { %v834_v25 = vadd.f32 %v1624_v39, %v833_v23 }
 0x22b   :  { %v923_v26 = vadd.f32 %v922_v24, %v834_v25 }
 0x22d   :  { %977 = vst [vmem:[#allocation2 + $0x88] sm:$0xff] %v923_v26 }
 0x230   :  { %v836_v27 = vpop.f32.mrf.mxu3  ;;  %v925_v28 = vpop.f32.mrf.mxu0 }
 0x231   :  { %v837_v29 = vadd.f32 %v1624_v39, %v836_v27 }
 0x233   :  { %v926_v30 = vadd.f32 %v925_v28, %v837_v29 }
 0x235   :  { %978 = vst [vmem:[#allocation2 + $0x90] sm:$0xff] %v926_v30 }
 0x238   :  { %v838_v31 = vpop.f32.mrf.mxu3  ;;  %v927_v33 = vpop.f32.mrf.mxu0 }
 0x239   :  { %v839_v34 = vadd.f32 %v1624_v39, %v838_v31 }
 0x23b   :  { %v928_v32 = vadd.f32 %v927_v33, %v839_v34 }
 0x23d   :  { %979 = vst [vmem:[#allocation2 + $0x98] sm:$0xff] %v928_v32 }
 0x240   :  { %v841_v35 = vpop.f32.mrf.mxu3  ;;  %v930_v36 = vpop.f32.mrf.mxu0 }
 0x241   :  { %v842_v37 = vadd.f32 %v1624_v39, %v841_v35 }
 0x243   :  { %v931_v38 = vadd.f32 %v930_v36, %v842_v37 }
 0x245   :  { %980 = vst [vmem:[#allocation2 + $0xa0] sm:$0xff] %v931_v38 }
 0x248   :  { %v843_v40 = vpop.f32.mrf.mxu3  ;;  %v932_v41 = vpop.f32.mrf.mxu0 }
 0x249   :  { %v844_v42 = vadd.f32 %v1624_v39, %v843_v40 }
 0x24b   :  { %v933_v43 = vadd.f32 %v932_v41, %v844_v42 }
 0x24d   :  { %981 = vst [vmem:[#allocation2 + $0xa8] sm:$0xff] %v933_v43 }
 0x250   :  { %v846_v44 = vpop.f32.mrf.mxu3  ;;  %v935_v45 = vpop.f32.mrf.mxu0 }
 0x251   :  { %v847_v46 = vadd.f32 %v1624_v39, %v846_v44 }
 0x253   :  { %v936_v47 = vadd.f32 %v935_v45, %v847_v46 }
 0x255   :  { %982 = vst [vmem:[#allocation2 + $0xb0] sm:$0xff] %v936_v47 }
 0x258   :  { %v848_v49 = vpop.f32.mrf.mxu3  ;;  %v937_v50 = vpop.f32.mrf.mxu0 }
 0x259   :  { %v849_v51 = vadd.f32 %v1624_v39, %v848_v49 }
 0x25b   :  { %v938_v52 = vadd.f32 %v937_v50, %v849_v51 }
 0x25d   :  { %983 = vst [vmem:[#allocation2 + $0xb8] sm:$0xff] %v938_v52 }
 0x260   :  { %v851_v53 = vpop.f32.mrf.mxu3  ;;  %v940_v55 = vpop.f32.mrf.mxu0 }
 0x261   :  { %v852_v48 = vadd.f32 %v1624_v39, %v851_v53 }
 0x263   :  { %v941_v54 = vadd.f32 %v940_v55, %v852_v48 }
 0x265   :  { %984 = vst [vmem:[#allocation2 + $0xc0] sm:$0xff] %v941_v54 }
 0x268   :  { %v853_v56 = vpop.f32.mrf.mxu3  ;;  %v942_v57 = vpop.f32.mrf.mxu0 }
 0x269   :  { %v854_v59 = vadd.f32 %v1624_v39, %v853_v56 }
 0x26b   :  { %v943_v60 = vadd.f32 %v942_v57, %v854_v59 }
 0x26d   :  { %985 = vst [vmem:[#allocation2 + $0xc8] sm:$0xff] %v943_v60 }
 0x270   :  { %v856_v61 = vpop.f32.mrf.mxu3  ;;  %v945_v62 = vpop.f32.mrf.mxu0 }
 0x271   :  { %v857_v63 = vadd.f32 %v1624_v39, %v856_v61 }
 0x273   :  { %v946_v1 = vadd.f32 %v945_v62, %v857_v63 }
 0x275   :  { %986 = vst [vmem:[#allocation2 + $0xd0] sm:$0xff] %v946_v1 }
 0x278   :  { %v858_v2 = vpop.f32.mrf.mxu3  ;;  %v947_v3 = vpop.f32.mrf.mxu0 }
 0x279   :  { %v859_v4 = vadd.f32 %v1624_v39, %v858_v2 }
 0x27b   :  { %v948_v5 = vadd.f32 %v947_v3, %v859_v4 }
 0x27d   :  { %987 = vst [vmem:[#allocation2 + $0xd8] sm:$0xff] %v948_v5 }
 0x280   :  { %v861_v6 = vpop.f32.mrf.mxu3  ;;  %v950_v7 = vpop.f32.mrf.mxu0 }
 0x281   :  { %v862_v8 = vadd.f32 %v1624_v39, %v861_v6 }
 0x283   :  { %v951_v9 = vadd.f32 %v950_v7, %v862_v8 }
 0x285   :  { %988 = vst [vmem:[#allocation2 + $0xe0] sm:$0xff] %v951_v9 }
 0x288   :  { %v863_v10 = vpop.f32.mrf.mxu3  ;;  %v952_v12 = vpop.f32.mrf.mxu0 }
 0x289   :  { %v864_v11 = vadd.f32 %v1624_v39, %v863_v10 }
 0x28b   :  { %v953_v13 = vadd.f32 %v952_v12, %v864_v11 }
 0x28d   :  { %989 = vst [vmem:[#allocation2 + $0xe8] sm:$0xff] %v953_v13 }
 0x290   :  { %v866_v58 = vpop.f32.mrf.mxu3 }
 0x291   :  { %v867_v22 = vadd.f32 %v1624_v39, %v866_v58 }
 0x296   :  { %v955_v14 = vpop.f32.mrf.mxu2 }
 0x297   :  { %v956_v15 = vadd.f32 %v955_v14, %v867_v22 }
 0x298   :  { %v868_v16 = vpop.f32.mrf.mxu3 }
 0x299   :  { %990 = vst [vmem:[#allocation2 + $0xf0] sm:$0xff] %v956_v15  ;;  %v869_v17 = vadd.f32 %v1624_v39, %v868_v16 }
 0x29e   :  { %v957_v18 = vpop.f32.mrf.mxu2 }
 0x29f   :  { %v958_v19 = vadd.f32 %v957_v18, %v869_v17 }
 0x2a1   :  { %991 = vst [vmem:[#allocation2 + $0xf8] sm:$0xff] %v958_v19 }
 0x2a2   :  { %1004 = dma.vmem_to_hbm [thread:$0]  %s997_s16, 4096, %s999_s19, [#allocation3], %s1234_s3, %s1234_s3, %s1235_s20  }
 0x2a3   :  { %1231 = dma.done.wait [#allocation3], 4096  }
 0x2a4   :  { %1232 = vsyncadd [#allocation3], 4294963200 }
 0x2a5   :  { %1009 = vsyncpa [#allocation3], 1 }

</bundles_post_ra>
